<compile_context>
chip_gen: v5e
topology: v5e:2x2
jax: 0.10.0
libtpu: 0.0.40
codegen_flags: <defaults>
</compile_context>

<pallas_src>
import jax
import jax.numpy as jnp
from jax.experimental import pallas as pl
from jax.experimental.pallas import tpu as pltpu


# ----------------------------------------------------------------------------
# Path A: real copy as a single HBM -> HBM DMA (preferred when a copy must be
# materialized).  No tiling, no VMEM round trip, DMA engine drives HBM at
# roofline with zero vld/vst bundle work.
# ----------------------------------------------------------------------------
def _hbm_copy_kernel(x_ref, o_ref, sem):
    cp = pltpu.make_async_copy(x_ref, o_ref, sem)
    cp.start()
    cp.wait()


def pallas_copy(x: jax.Array) -> jax.Array:
    return pl.pallas_call(
        _hbm_copy_kernel,
        out_shape=jax.ShapeDtypeStruct(x.shape, x.dtype),
        in_specs=[pl.BlockSpec(memory_space=pl.ANY)],
        out_specs=pl.BlockSpec(memory_space=pl.ANY),
        scratch_shapes=[pltpu.SemaphoreType.DMA(())],
        compiler_params=pltpu.CompilerParams(vmem_limit_bytes=16 << 20),
    )(x)


# ----------------------------------------------------------------------------
# Path B: tiled VMEM identity (structural example of BlockSpec pipelining).
# Full-width lane-dense blocks only (never splits columns), 1-D grid over rows.
# ----------------------------------------------------------------------------
def _identity_tile_kernel(x_ref, o_ref):
    o_ref[...] = x_ref[...]


def _num_tensorcores() -> int:
    """Best-effort TensorCores-per-chip (v7x: 2; v5e/v6e: 1)."""
    try:
        info = pltpu.get_tpu_info()
        for attr in ("num_cores", "core_count", "tensorcore_count",
                     "cores_per_chip", "num_tensorcores"):
            v = getattr(info, attr, None)
            if isinstance(v, int) and v > 0:
                return v
    except Exception:
        pass
    return 1  # conservative: no forced grid split on single-TC chips


def _choose_row_tile(rows, cols, itemsize, max_block_bytes, num_tc):
    """Largest full-width row tile under the VMEM block budget."""
    sub = max(8, 32 // max(1, itemsize))       # sublane pack: 8 f32 / 16 bf16 / 32 i8
    row_bytes = max(1, cols * itemsize)
    tile_rows = max(sub, (max_block_bytes // row_bytes) // sub * sub)
    padded_rows = pl.cdiv(rows, sub) * sub
    tile_rows = min(tile_rows, padded_rows)
    if num_tc >= 2 and padded_rows > sub:
        # Multi-TC (v7x): keep >=2 (even) steps on the leading parallel axis so
        # both TensorCores' DMA queues stay busy.
        steps = pl.cdiv(rows, tile_rows)
        if steps < 2 or steps % 2:
            target = max(2, steps + (steps % 2))
            tile_rows = max(sub, pl.cdiv(pl.cdiv(rows, target), sub) * sub)
    return tile_rows


def pallas_identity(x: jax.Array,
                    *,
                    alias_in_out: bool = True,
                    max_block_bytes: int = 4 << 20) -> jax.Array:
    if alias_in_out:
        # Perf review: an in-place identity is a full N-byte read + N-byte
        # write of identical data — skip the kernel entirely.
        return x
    rows, cols = x.shape
    itemsize = x.dtype.itemsize
    num_tc = _num_tensorcores()
    tile_rows = _choose_row_tile(rows, cols, itemsize, max_block_bytes, num_tc)
    block_bytes = tile_rows * cols * itemsize
    # Double-buffered input + double-buffered output = 4 resident blocks.
    vmem_limit = min(96 << 20, max(16 << 20, 4 * block_bytes + (8 << 20)))
    grid = (pl.cdiv(rows, tile_rows),)          # 1-D grid, full-width blocks
    return pl.pallas_call(
        _identity_tile_kernel,
        out_shape=jax.ShapeDtypeStruct((rows, cols), x.dtype),
        grid=grid,
        in_specs=[pl.BlockSpec((tile_rows, cols), lambda i: (i, 0))],
        out_specs=pl.BlockSpec((tile_rows, cols), lambda i: (i, 0)),
        compiler_params=pltpu.CompilerParams(
            dimension_semantics=("parallel",),
            vmem_limit_bytes=vmem_limit,
        ),
    )(x)


# ----------------------------------------------------------------------------
# Faithful translation of the (empty) PyTorch Decoder module.
# ----------------------------------------------------------------------------
class Decoder:
    def __init__(self):
        # Reference __init__ declares no parameters.
        pass

    def forward(self):
        # Reference forward takes no inputs and returns None.
        return None

    __call__ = forward


if __name__ == "__main__":
    # Exercise the (no-op) Decoder exactly as the reference defines it.
    decoder = Decoder()
    out = decoder()
    assert out is None  # matches `def forward(self): pass`

    key = jax.random.PRNGKey(0)
    x = jax.random.normal(key, (256, 512), dtype=jnp.float32)

    # Path 0: aliased / no-op identity -> no kernel launched, returns input.
    y_alias = pallas_identity(x, alias_in_out=True)
    assert y_alias is x

    # Path A: real copy as a single HBM->HBM DMA.
    y_dma = pallas_copy(x)
    jax.block_until_ready(y_dma)
    assert jnp.allclose(y_dma, x)

    # Path B: tiled VMEM identity (full-width blocks, 1-D grid).
    y_tiled = pallas_identity(x, alias_in_out=False)
    jax.block_until_ready(y_tiled)
    assert jnp.allclose(y_tiled, x)

    print("KERNEL_OK")
</pallas_src>

<mosaic_0001>
module attributes {stable_mosaic.version = 11 : i64} {
  func.func @_hbm_copy_kernel(%arg0: memref<256x512xf32, #tpu.memory_space<any>>, %arg1: memref<256x512xf32, #tpu.memory_space<any>>, %arg2: memref<!tpu.dma_semaphore, #tpu.memory_space<semaphore_mem>>) attributes {dimension_semantics = [], scalar_prefetch = 0 : i64, scratch_operands = 1 : i64, tpu.core_type = #tpu.core_type<tc>} {
    tpu.enqueue_dma source(%arg0 : memref<256x512xf32, #tpu.memory_space<any>>) target(%arg1 : memref<256x512xf32, #tpu.memory_space<any>>) target_semaphore(%arg2 : memref<!tpu.dma_semaphore, #tpu.memory_space<semaphore_mem>>)
    tpu.wait_dma2 semaphore(%arg2 : memref<!tpu.dma_semaphore, #tpu.memory_space<semaphore_mem>>) src(%arg0 : memref<256x512xf32, #tpu.memory_space<any>>) dst(%arg1 : memref<256x512xf32, #tpu.memory_space<any>>)
    return
  }
}

</mosaic_0001>

<bundles_post_ra>
// kernel: tpu_custom_call.1
= control target key start
LH: loop header
LB: loop body
LE: loop exit
PB: predicated region body
PF: predicated region fallthrough
CT: control target
= control target key end

     0   :  { %s33_s12 = smov [#allocation2]   ;;  %s34_s13 = smov [#allocation3]   ;;  %s52_s0 = inlined_call_operand.hbm [shape: f32[256,512], index: 0, kind: input, shape index: {}]   ;;  %s53_s1 = inlined_call_operand.hbm [shape: f32[256,512], index: 1, kind: output, shape index: {}]  }
   0x1   :  { %s10_s8 = sshll.u32 %s52_s0, 4  ;;  %s12_s11 = sshll.u32 %s53_s1, 4  ;;  %s11_s8 = int_to_ptr.hbm [resolvable:$true] %s10_s8  ;;  %s13_s11 = int_to_ptr.hbm [resolvable:$true] %s12_s11 }
   0x2   :  { %s35_s14 = smov 0  }
   0x3   :  { %16 = dma.general %s11_s8, 16384, %s13_s11, %s33_s12, %s34_s13, [#allocation4], %s35_s14, 0  }
   0x4   :  { %31 = dma.done.wait [#allocation2], 16384 }
   0x5   :  { %32 = vsyncadd [#allocation2], 4294950912 }
   0x6   :  { %21 = vsyncmov [#allocation2] }
   0x9   :  { %s22_s15 = vpop.sfrf %21 }
   0xa   :  { %p27_p0 = scmp.ne.s32.totalorder %s22_s15, 0 }
   0xc   :  { %26 = shalt.err (%p27_p0)  }

</bundles_post_ra>
